<compile_context>
chip_gen: v7x
topology: tpu7x:2x2x1
jax: 0.10.0
libtpu: 0.0.40
codegen_flags: <defaults>
</compile_context>

<pallas_src>
import functools

import jax
import jax.numpy as jnp
from jax.experimental import pallas as pl
from jax.experimental.pallas import tpu as pltpu


def _round_up(x: int, m: int) -> int:
    return ((x + m - 1) // m) * m


def mlp_kernel(x_ref, w1_ref, b1_ref, w2_ref, b2_ref, o_ref):
    # x_ref:  [TB, In]   f32   (cast to bf16 on the VPU -- no wrapper cast pass)
    # w1_ref: [In, H]    bf16  (VMEM-resident across grid steps)
    # b1_ref: [1,  H]    f32
    # w2_ref: [H,  Opad] bf16  (padded columns are 0)
    # b2_ref: [1,  Opad] f32   (padded lanes hold -1e30 so their softmax mass is 0)
    # o_ref:  [TB, Opad] bf16  (lane-dense output, half the writeback of f32)
    x = x_ref[...].astype(jnp.bfloat16)
    h = jnp.dot(x, w1_ref[...], preferred_element_type=jnp.float32)     # MXU, f32 acc
    h = jnp.maximum(h + b1_ref[...], 0.0)                               # bias + ReLU in f32
    logits = jnp.dot(h.astype(jnp.bfloat16), w2_ref[...],
                     preferred_element_type=jnp.float32) + b2_ref[...]
    # Numerically stable softmax over the padded feature axis. Padded lanes carry
    # logits ~ -1e30 (not -inf, to avoid (-inf)-(-inf) NaNs), so exp underflows to
    # exactly 0 and they contribute nothing to the denominator.
    m = jnp.max(logits, axis=-1, keepdims=True)
    e = jnp.exp(logits - m)
    denom = jnp.sum(e, axis=-1, keepdims=True)
    # Exact divide (NOT approx reciprocal): rows must sum to 1; divide cost is
    # hidden because the kernel is memory-bound.
    o_ref[...] = (e / denom).astype(o_ref.dtype)


def xavier_uniform(key, fan_out, fan_in, dtype=jnp.float32):
    # Matches torch.nn.init.xavier_uniform_ on a Linear weight of shape (out, in).
    limit = (6.0 / (fan_in + fan_out)) ** 0.5
    return jax.random.uniform(key, (fan_out, fan_in), dtype, minval=-limit, maxval=limit)


def prepare_params(w1, b1, w2, b2):
    """One-time glue on PyTorch-shaped params: w1 [H,In], b1 [H], w2 [O,H], b2 [O].

    Hoisted out of the per-call path so repeated forward calls reuse the
    transposed / padded / bf16-cast weights.
    """
    H, In = w1.shape
    O = w2.shape[0]
    O_pad = _round_up(O, 128)                                             # lane-dense N
    w1_t = w1.T.astype(jnp.bfloat16)                                      # [In, H]
    w2_t = jnp.pad(w2.T, ((0, 0), (0, O_pad - O))).astype(jnp.bfloat16)   # [H, O_pad]
    b1_2d = b1.reshape(1, H).astype(jnp.float32)                          # [1, H]
    b2_2d = jnp.pad(b2.reshape(1, O).astype(jnp.float32),
                    ((0, 0), (0, O_pad - O)), constant_values=-1e30)      # [1, O_pad]
    return w1_t, b1_2d, w2_t, b2_2d


@functools.partial(jax.jit, static_argnames=("out_features", "tile_b"))
def custom_relu_forward(x, w1_t, b1_2d, w2_t, b2_2d, *, out_features, tile_b=4096):
    """x: [B, In] f32; prepared params from prepare_params(); returns [B, O] f32."""
    B, In = x.shape
    H = w1_t.shape[1]
    O_pad = w2_t.shape[1]

    # ---- batch tile sizing -------------------------------------------------
    Bp = _round_up(B, 8)
    TB = min(int(tile_b), Bp)
    # v7x megacore: guarantee >= 2 grid steps along the "parallel" batch axis
    # whenever there are enough rows, so both TensorCores get work.
    if Bp >= 16:
        TB = min(TB, Bp // 2)
    TB = max(8, (TB // 8) * 8)
    # VMEM budget: double-buffered x (f32) + out (bf16) tiles, f32 temporaries
    # (h, logits, e) and the resident weights. Kept under ~12 MiB so the default
    # scoped VMEM limit is fine on v5e/v6e/v7x without raising vmem_limit_bytes.
    per_row = 2 * In * 4 + 2 * O_pad * 2 + (H + 2 * O_pad) * 4
    const = (In * H + H * O_pad) * 2 + (H + O_pad) * 4
    budget = 12 * 1024 * 1024
    tb_cap = max(8, ((budget - const) // per_row // 8) * 8)
    TB = min(TB, tb_cap)
    Bp = _round_up(Bp, TB)
    grid = (Bp // TB,)

    if Bp != B:
        x = jnp.pad(x, ((0, Bp - B), (0, 0)))      # only when batch padding is needed

    bytes_accessed = (Bp * In * 4 + In * H * 2 + H * O_pad * 2
                      + H * 4 + O_pad * 4 + Bp * O_pad * 2)

    out = pl.pallas_call(
        mlp_kernel,
        out_shape=jax.ShapeDtypeStruct((Bp, O_pad), jnp.bfloat16),
        grid=grid,
        in_specs=[
            pl.BlockSpec((TB, In), lambda i: (i, 0)),        # x: tiled over batch
            pl.BlockSpec((In, H), lambda i: (0, 0)),         # w1: VMEM-resident
            pl.BlockSpec((1, H), lambda i: (0, 0)),          # b1: VMEM-resident
            pl.BlockSpec((H, O_pad), lambda i: (0, 0)),      # w2: VMEM-resident
            pl.BlockSpec((1, O_pad), lambda i: (0, 0)),      # b2: VMEM-resident
        ],
        out_specs=pl.BlockSpec((TB, O_pad), lambda i: (i, 0)),
        compiler_params=pltpu.CompilerParams(
            dimension_semantics=("parallel",)),
        cost_estimate=pl.CostEstimate(
            flops=2 * Bp * (In * H + H * O_pad),
            transcendentals=Bp * O_pad,
            bytes_accessed=bytes_accessed),
    )(x, w1_t, b1_2d, w2_t, b2_2d)

    # Drop batch padding and padded output lanes; the final (B, O) result is tiny,
    # so casting back to f32 (module returns f32) is negligible.
    return out[:B, :out_features].astype(jnp.float32)


if __name__ == "__main__":
    # Small shapes consistent with the module: Linear(input, hidden) -> Linear(hidden, output).
    # batch=30 (non-multiple of 8) exercises batch padding; the TB <= Bp/2 clamp
    # gives a 2-step grid so the pipelined / megacore path is exercised too.
    batch, input_size, hidden_size, output_size = 30, 32, 64, 16

    key = jax.random.PRNGKey(0)
    kx, kw1, kw2 = jax.random.split(key, 3)

    x = jax.random.normal(kx, (batch, input_size), dtype=jnp.float32)
    # Deterministic Xavier-uniform weights, zero biases (matches _weights_init_xavier).
    w1 = xavier_uniform(kw1, hidden_size, input_size)   # [H, In]
    b1 = jnp.zeros((hidden_size,), jnp.float32)
    w2 = xavier_uniform(kw2, output_size, hidden_size)  # [O, H]
    b2 = jnp.zeros((output_size,), jnp.float32)

    params = prepare_params(w1, b1, w2, b2)             # glue hoisted, done once
    out = custom_relu_forward(x, *params, out_features=output_size)
    out = jax.block_until_ready(out)

    # Pure-JAX reference with the same bf16-operand / f32-accumulate matmuls.
    h_ref = jnp.maximum(
        jnp.dot(x.astype(jnp.bfloat16), w1.T.astype(jnp.bfloat16),
                preferred_element_type=jnp.float32) + b1, 0.0)
    logits_ref = jnp.dot(h_ref.astype(jnp.bfloat16), w2.T.astype(jnp.bfloat16),
                         preferred_element_type=jnp.float32) + b2
    ref = jax.nn.softmax(logits_ref, axis=1)

    assert out.shape == (batch, output_size)
    assert out.dtype == jnp.float32
    assert bool(jnp.all(jnp.isfinite(out)))
    # bf16 kernel output + bf16 matmul operands -> ~1e-2 tolerance vs f32 softmax math.
    assert jnp.allclose(out, ref, atol=1e-2, rtol=1e-2)
    # Exact divide in the kernel: rows sum to 1 up to bf16 output quantization.
    assert jnp.allclose(jnp.sum(out, axis=1), 1.0, atol=1e-2)

    print("KERNEL_OK")
</pallas_src>

<mosaic_0001>
module attributes {stable_mosaic.version = 11 : i64} {
  func.func @mlp_kernel(%arg0: i32, %arg1: memref<16x32xf32, #tpu.memory_space<vmem>>, %arg2: memref<32x64xbf16, #tpu.memory_space<vmem>>, %arg3: memref<1x64xf32, #tpu.memory_space<vmem>>, %arg4: memref<64x128xbf16, #tpu.memory_space<vmem>>, %arg5: memref<1x128xf32, #tpu.memory_space<vmem>>, %arg6: memref<16x128xbf16, #tpu.memory_space<vmem>>) attributes {dimension_semantics = [#tpu.dimension_semantics<parallel>], iteration_bounds = array<i64: 2>, scalar_prefetch = 0 : i64, scratch_operands = 0 : i64, tpu.core_type = #tpu.core_type<tc>, window_params = [{transform_indices = @transform_0, window_bounds = array<i64: 16, 32>}, {pipeline_mode = #tpu.pipeline_mode<synchronous>, transform_indices = @transform_1, window_bounds = array<i64: 32, 64>}, {pipeline_mode = #tpu.pipeline_mode<synchronous>, transform_indices = @transform_2, window_bounds = array<i64: 1, 64>}, {pipeline_mode = #tpu.pipeline_mode<synchronous>, transform_indices = @transform_3, window_bounds = array<i64: 64, 128>}, {pipeline_mode = #tpu.pipeline_mode<synchronous>, transform_indices = @transform_4, window_bounds = array<i64: 1, 128>}, {transform_indices = @transform_5, window_bounds = array<i64: 16, 128>}]} {
    %c0 = arith.constant 0 : index
    %c0_0 = arith.constant 0 : index
    %0 = vector.load %arg1[%c0, %c0_0] : memref<16x32xf32, #tpu.memory_space<vmem>>, vector<16x32xf32>
    %1 = arith.truncf %0 : vector<16x32xf32> to vector<16x32xbf16>
    %c0_1 = arith.constant 0 : index
    %c0_2 = arith.constant 0 : index
    %2 = vector.load %arg2[%c0_1, %c0_2] : memref<32x64xbf16, #tpu.memory_space<vmem>>, vector<32x64xbf16>
    %cst = arith.constant dense<0.000000e+00> : vector<16x64xf32>
    %3 = tpu.matmul %1, %2, %cst {dimension_numbers = #tpu.dot_dimension_numbers<[1], [0], [0], [1], [0, 0, 1, 1], [], []>} : vector<16x32xbf16>, vector<32x64xbf16>, vector<16x64xf32> -> vector<16x64xf32>
    %c0_3 = arith.constant 0 : index
    %c0_4 = arith.constant 0 : index
    %4 = vector.load %arg3[%c0_3, %c0_4] : memref<1x64xf32, #tpu.memory_space<vmem>>, vector<1x64xf32>
    %5 = vector.broadcast %4 : vector<1x64xf32> to vector<16x64xf32>
    %6 = arith.addf %3, %5 : vector<16x64xf32>
    %cst_5 = arith.constant 0.000000e+00 : f32
    %7 = vector.broadcast %cst_5 : f32 to vector<16x64xf32>
    %8 = arith.maximumf %6, %7 : vector<16x64xf32>
    %9 = arith.truncf %8 : vector<16x64xf32> to vector<16x64xbf16>
    %c0_6 = arith.constant 0 : index
    %c0_7 = arith.constant 0 : index
    %10 = vector.load %arg4[%c0_6, %c0_7] : memref<64x128xbf16, #tpu.memory_space<vmem>>, vector<64x128xbf16>
    %cst_8 = arith.constant dense<0.000000e+00> : vector<16x128xf32>
    %11 = tpu.matmul %9, %10, %cst_8 {dimension_numbers = #tpu.dot_dimension_numbers<[1], [0], [0], [1], [0, 0, 1, 1], [], []>} : vector<16x64xbf16>, vector<64x128xbf16>, vector<16x128xf32> -> vector<16x128xf32>
    %c0_9 = arith.constant 0 : index
    %c0_10 = arith.constant 0 : index
    %12 = vector.load %arg5[%c0_9, %c0_10] : memref<1x128xf32, #tpu.memory_space<vmem>>, vector<1x128xf32>
    %13 = vector.broadcast %12 : vector<1x128xf32> to vector<16x128xf32>
    %14 = arith.addf %11, %13 : vector<16x128xf32>
    %cst_11 = arith.constant dense<0xFF800000> : vector<16xf32>
    %15 = vector.multi_reduction <maximumf>, %14, %cst_11 [1] : vector<16x128xf32> to vector<16xf32>
    %16 = vector.shape_cast %15 : vector<16xf32> to vector<16x1xf32>
    %17 = vector.broadcast %16 : vector<16x1xf32> to vector<16x128xf32>
    %18 = arith.subf %14, %17 : vector<16x128xf32>
    %19 = math.exp %18 : vector<16x128xf32>
    %cst_12 = arith.constant dense<0.000000e+00> : vector<16xf32>
    %20 = vector.multi_reduction <add>, %19, %cst_12 [1] : vector<16x128xf32> to vector<16xf32>
    %21 = vector.shape_cast %20 : vector<16xf32> to vector<16x1xf32>
    %22 = vector.broadcast %21 : vector<16x1xf32> to vector<16x128xf32>
    %23 = arith.divf %19, %22 : vector<16x128xf32>
    %24 = arith.truncf %23 : vector<16x128xf32> to vector<16x128xbf16>
    %c0_13 = arith.constant 0 : index
    %c0_14 = arith.constant 0 : index
    %25 = vector.load %arg6[%c0_13, %c0_14] : memref<16x128xbf16, #tpu.memory_space<vmem>>, vector<16x128xbf16>
    tpu.vector_store %arg6[%c0_13, %c0_14], %24 {strides = array<i32>} : memref<16x128xbf16, #tpu.memory_space<vmem>>, vector<16x128xbf16>,
    return
  }
  func.func @transform_0(%arg0: i32) -> (i32, i32) {
    %c0_i32 = arith.constant 0 : i32
    %c0_i32_0 = arith.constant 0 : i32
    return %arg0, %c0_i32 : i32, i32
  }
  func.func @transform_1(%arg0: i32) -> (i32, i32) {
    %c0_i32 = arith.constant 0 : i32
    %c0_i32_0 = arith.constant 0 : i32
    %c0_i32_1 = arith.constant 0 : i32
    return %c0_i32, %c0_i32_0 : i32, i32
  }
  func.func @transform_2(%arg0: i32) -> (i32, i32) {
    %c0_i32 = arith.constant 0 : i32
    %c0_i32_0 = arith.constant 0 : i32
    %c0_i32_1 = arith.constant 0 : i32
    return %c0_i32, %c0_i32_0 : i32, i32
  }
  func.func @transform_3(%arg0: i32) -> (i32, i32) {
    %c0_i32 = arith.constant 0 : i32
    %c0_i32_0 = arith.constant 0 : i32
    %c0_i32_1 = arith.constant 0 : i32
    return %c0_i32, %c0_i32_0 : i32, i32
  }
  func.func @transform_4(%arg0: i32) -> (i32, i32) {
    %c0_i32 = arith.constant 0 : i32
    %c0_i32_0 = arith.constant 0 : i32
    %c0_i32_1 = arith.constant 0 : i32
    return %c0_i32, %c0_i32_0 : i32, i32
  }
  func.func @transform_5(%arg0: i32) -> (i32, i32) {
    %c0_i32 = arith.constant 0 : i32
    %c0_i32_0 = arith.constant 0 : i32
    return %arg0, %c0_i32 : i32, i32
  }
}

</mosaic_0001>

<bundles_post_ra>
// kernel: custom_relu_forward.1
= control target key start
LH: loop header
LB: loop body
LE: loop exit
PB: predicated region body
PF: predicated region fallthrough
CT: control target
= control target key end

     0   :  { %s593_s18 = smov 0   ;;  %s638_s0 = inlined_call_operand.vmem [shape: f32[32,32], index: 0, kind: input, shape index: {}]   ;;  %s639_s1 = inlined_call_operand.vmem [shape: bf16[32,64], index: 1, kind: input, shape index: {}]   ;;  %s640_s2 = inlined_call_operand.vmem [shape: f32[1,64], index: 2, kind: input, shape index: {}]   ;;  %s641_s3 = inlined_call_operand.vmem [shape: bf16[64,128], index: 3, kind: input, shape index: {}]   ;;  %s642_s4 = inlined_call_operand.vmem [shape: f32[1,128], index: 4, kind: input, shape index: {}]   ;;  %s643_s5 = inlined_call_operand.vmem [shape: bf16[32,128], index: 5, kind: output, shape index: {}]  }
   0x1 LB: > { %s471_s19 = sadd.s32 4294967295, %s559_s18   ;;  %p475_p0 = scmp.ge.s32.totalorder %s559_s18, 1  ;;  %s559_s18 = sphi %s593_s18, %s15_s18  }
   0x2   : > { %p188_p1 = scmp.lt.s32.totalorder %s559_s18, 3 }
   0x4   : > { %p189_p2 = pnand %p475_p0, %p188_p1 }
   0x5   : > { %v539_v0 = vld [vmem:[%s639_s1] sm:$0xff] (!%p189_p2)   ;;  %v561_v1 = vmov (!%p189_p2), 0.0   ;;  %v540_v2 = vld [vmem:[%s639_s1 + $0x8] sm:$0xff] (!%p189_p2)   ;;  %vm562_vm0 = vmmov (!%p189_p2), 0   ;;  %s476_s24 = sshll.u32 (!%p189_p2), %s471_s19, 1  ;;  %vm255_vm1 = vcmask (!%p189_p2), 261120  }
   0x6   : > { %192 = sbr.rel (%p189_p2) target bundleno = 772 (0x304), region = 40  ;;  %509 = vmatprep.subr.bf16.mxu0 (!%p189_p2), %v561_v1  ;;  %517 = vmatprep.subr.bf16.mxu1 (!%p189_p2), %v561_v1  ;;  %p217_p3 = scmp.lt.s32.totalorder (!%p189_p2), %s476_s24, 3  ;;  %v541_v3 = vld [vmem:[%s641_s3] sm:$0xff] (!%p189_p2)   ;;  %v542_v4 = vld [vmem:[%s641_s3 + $0x8] sm:$0xff] (!%p189_p2)   ;;  %v543_v8 = vld [vmem:[%s641_s3 + $0x10] sm:$0xff] (!%p189_p2)   ;;  %vm342_vm2 = vcmask (!%p189_p2), 523264  }
   0x7   : > { %510 = vmatpush3.bf16.msra.mxu0 (!%p189_p2), %v539_v0  ;;  %513 = vmatprep.mubr.msk.bf16.mxu0 (!%p189_p2), %vm562_vm0, %v561_v1  ;;  %v544_v9 = vld [vmem:[%s641_s3 + $0x18] sm:$0xff] (!%p189_p2)   ;;  %v480_v10 = vld [vmem:[%s640_s2] ss:$0 sm:$0xff] (!%p189_p2) }
   0x8   : > { %511 = vmatprep.subr.bf16.mxu0 (!%p189_p2), %v561_v1  ;;  %525 = vmatprep.mubr.msk.bf16.mxu1 (!%p189_p2), %vm562_vm0, %v561_v1  ;;  %v484_v20 = vld [vmem:[%s642_s4] ss:$0 sm:$0xff] (!%p189_p2) }
   0x9   : > { %518 = vmatpush3.bf16.msra.mxu1 (!%p189_p2), %v541_v3 }
   0xa   : > { %519 = vmatprep.subr.bf16.mxu1 (!%p189_p2), %v561_v1 }
   0xb   : > { %512 = vmatpush3.bf16.msra.mxu0 (!%p189_p2), %v540_v2 }
   0xd   : > { %s645_s24 = smov (!%p217_p3, %s476_s24), 3  ;;  %520 = vmatpush3.bf16.msra.mxu1 %v542_v4 }
   0xe   : > { %s477_s29 = sshll.u32 %s645_s24, 3  ;;  %521 = vmatprep.subr.bf16.mxu1 %v561_v1  ;;  %s479_s16 = sshll.u32 %s645_s24, 2 }
   0xf   : > { %s220_s7 = scalar_lea.vmem %s638_s0, %s477_s29  ;;  %s226_s20 = scalar_lea.vmem %s643_s5, %s479_s16 }
  0x10   : > { %v229_v5 = vld [vmem:[%s220_s7] sm:$0xff]  ;;  %v230_v6 = vld [vmem:[%s220_s7 + $0x8] sm:$0xff] }
  0x11   : > { %v231_v7 = vpack.c.bf16 %v230_v6, %v229_v5  ;;  %522 = vmatpush3.bf16.msra.mxu1 %v543_v8 }
  0x12   : > { %523 = vmatprep.subr.bf16.mxu1 %v561_v1 }
  0x13   : > { %514 = vmatmul.mubr.msk.bf16.vlgmr.msra.gmra.mrb[0].mxu0 %vm255_vm1, %v231_v7 }
  0x15   : > { %524 = vmatpush3.bf16.msra.mxu1 %v544_v9 }
  0xe6   : > { %v293_v11 = vpop.f32.mrb[0].mxu0 }
  0xe7   : > { %v294_v12 = vadd.f32 %v480_v10, %v293_v11  ;;  %v515_v13 = vpop.f32.mrb[1].mxu0 }
  0xe8   : > { %v296_v14 = vpop.f32.mrb[2].mxu0 }
  0xe9   : > { %v297_v15 = vadd.f32 %v480_v10, %v296_v14  ;;  %v516_v16 = vpop.f32.mrb[3].mxu0  ;;  %v300_v17 = vmax.f32 %v294_v12, 0.0 }
  0xeb   : > { %v301_v18 = vmax.f32 %v297_v15, 0.0 }
  0xed   : > { %v302_v19 = vpack.c.bf16 %v301_v18, %v300_v17 }
  0xef   : > { %526 = vmatmul.mubr.msk.bf16.vlgmr.msra.gmra.mrb[0].mxu1 %vm342_vm2, %v302_v19 }
 0x1c2   : > { %v380_v21 = vpop.f32.mrb[0].mxu1 }
 0x1c3   : > { %v381_v22 = vadd.f32 %v484_v20, %v380_v21  ;;  %v527_v23 = vpop.f32.mrb[1].mxu1 }
 0x1c4   : > { %v383_v24 = vpop.f32.mrb[2].mxu1 }
 0x1c5   : > { %387 = vmax.xlane.f32.xlu0 %v381_v22  ;;  %v528_v25 = vpop.f32.mrb[3].mxu1  ;;  %v384_v26 = vadd.f32 %v484_v20, %v383_v24 }
 0x1c9   : > { %389 = vmax.xlane.f32.xlu0 %v384_v26 }
 0x252   : > { %v388_v27 = vpop.xlane.xlu0 %387 }
 0x253   : > { %v391_v28 = vsub.f32 %v381_v22, %v388_v27 }
 0x255   : > { %v393_v29 = vmul.f32 1.442695, %v391_v28 }
 0x256   : > { %v390_v30 = vpop.xlane.xlu0 %389 }
 0x257   : > { %545 = vpow2.f32 %v393_v29  ;;  %v392_v31 = vsub.f32 %v384_v26, %v390_v30 }
 0x259   : > { %v395_v32 = vmul.f32 1.442695, %v392_v31 }
 0x25b   : > { %547 = vpow2.f32 %v395_v32 }
 0x261   : > { %v546_v33 = vpop.eup %545 }
 0x262   : > { %397 = vadd.xlane.f32.xlu1 %v546_v33 }
 0x265   : > { %v548_v34 = vpop.eup %547 }
 0x266   : > { %399 = vadd.xlane.f32.xlu1 %v548_v34 }
 0x2ef   : > { %v398_v35 = vpop.xlane.xlu1 %397 }
 0x2f0   : > { %549 = vrcp.f32 %v398_v35 }
 0x2f3   : > { %v400_v36 = vpop.xlane.xlu1 %399 }
 0x2f4   : > { %551 = vrcp.f32 %v400_v36 }
 0x2fa   : > { %v550_v37 = vpop.eup %549 }
 0x2fb   : > { %v402_v39 = vmul.f32 %v550_v37, %v546_v33 }
 0x2fe   : > { %v552_v38 = vpop.eup %551 }
 0x2ff   : > { %v404_v40 = vmul.f32 %v552_v38, %v548_v34 }
 0x301   : > { %v499_v41 = vpack.c.bf16 %v404_v40, %v402_v39 }
 0x303   : > { %500 = vst [vmem:[%s226_s20] sm:$0xff] %v499_v41  }
 0x304 PF: > { %s15_s18 = sadd.s32 1, %s559_s18  }
 0x305   : > { %p12_p4 = scmp.ge.s32.totalorder %s15_s18, 4  }
 0x307   :  { %14 = sbr.rel (!%p12_p4) target bundleno = 1 (0x1), region = 70 }

</bundles_post_ra>
